<compile_context>
chip_gen: v5e
topology: v5e:2x2
jax: 0.10.0
libtpu: 0.0.40
codegen_flags: <defaults>
</compile_context>

<pallas_src>
import jax
import jax.numpy as jnp
from jax.experimental import pallas as pl
from jax.experimental.pallas import tpu as pltpu


def _round_up(x: int, m: int) -> int:
    return (x + m - 1) // m * m


def _one_hot_embed_kernel(tok_ref, out_ref):
    # tok_ref: (T, 1) int32 token ids for this tile.
    # out_ref: (T, D) float32 output tile == eye(D)[tok, :].
    T, D = out_ref.shape
    tok = tok_ref[...]                                        # (T, 1) int32
    col = jax.lax.broadcasted_iota(jnp.int32, (T, D), 1)      # column ids
    out_ref[...] = (col == tok).astype(out_ref.dtype)         # one-hot rows


def _choose_tile_tokens(n_tokens: int, d_model: int, target_bytes: int = 4 << 20) -> int:
    """Pick a token-tile size: multiple of 8 sublanes, ~target_bytes of f32
    output per grid step, never larger than the (sublane-rounded) token count."""
    rows_for_target = max(1, target_bytes // (d_model * 4))
    t = max(8, (rows_for_target // 8) * 8)
    t = min(t, _round_up(n_tokens, 8))
    return t


def embed(tokens: jax.Array, d_model: int) -> jax.Array:
    """tokens: (batch, position) integer ids in [0, d_model).

    Returns (batch, position, d_model) float32 == eye(d_model)[tokens, :],
    i.e. exactly the PyTorch module's forward (whose W_E is the identity).
    """
    B, P = tokens.shape
    D = d_model
    N = B * P

    T = _choose_tile_tokens(N, D)

    tok_2d = tokens.reshape(N, 1).astype(jnp.int32)

    out_flat = pl.pallas_call(
        _one_hot_embed_kernel,
        out_shape=jax.ShapeDtypeStruct((N, D), jnp.float32),
        grid_spec=pl.GridSpec(
            # cdiv grid: last block may be partial; Pallas masks its stores,
            # so no padding / post-slice copy of the output is needed.
            grid=(pl.cdiv(N, T),),
            in_specs=[
                # One (T, 1) column of token ids per step.
                pl.BlockSpec((T, 1), lambda i: (i, 0)),
            ],
            # Dense (T, D) output tile: last dim == full d_model -> lane-dense,
            # unmasked full-width stores + big writeback DMAs.
            out_specs=pl.BlockSpec((T, D), lambda i: (i, 0)),
        ),
        compiler_params=pltpu.CompilerParams(
            # Independent output tiles -> legally parallel (both TCs on v7x).
            dimension_semantics=("parallel",),
            # Headroom for the double-buffered ~4 MiB output tiles.
            vmem_limit_bytes=32 << 20,
        ),
    )(tok_2d)

    return out_flat.reshape(B, P, D)


if __name__ == "__main__":
    # Small config consistent with the module: d_vocab == d_model.
    d_model = 128
    batch, pos = 2, 8

    key = jax.random.PRNGKey(0)
    tokens = jax.random.randint(key, (batch, pos), 0, d_model, dtype=jnp.int32)

    out = jax.block_until_ready(embed(tokens, d_model))

    # Reference semantics check against the module's W_E = eye(d_model).
    W_E = jnp.eye(d_model, dtype=jnp.float32)
    ref = W_E[tokens, :]
    assert out.shape == (batch, pos, d_model)
    assert out.dtype == jnp.float32
    assert jnp.array_equal(out, ref)

    print("KERNEL_OK")
</pallas_src>

<mosaic_0001>
module attributes {stable_mosaic.version = 11 : i64} {
  func.func @_one_hot_embed_kernel(%arg0: i32, %arg1: memref<16x1xi32, #tpu.memory_space<vmem>>, %arg2: memref<16x128xf32, #tpu.memory_space<vmem>>) attributes {dimension_semantics = [#tpu.dimension_semantics<parallel>], iteration_bounds = array<i64: 1>, scalar_prefetch = 0 : i64, scratch_operands = 0 : i64, tpu.core_type = #tpu.core_type<tc>, window_params = [{transform_indices = @transform_0, window_bounds = array<i64: 16, 1>}, {transform_indices = @transform_1, window_bounds = array<i64: 16, 128>}]} {
    %c0 = arith.constant 0 : index
    %c0_0 = arith.constant 0 : index
    %0 = vector.load %arg1[%c0, %c0_0] : memref<16x1xi32, #tpu.memory_space<vmem>>, vector<16x1xi32>
    %1 = tpu.iota {dimensions = array<i32: 1>} : vector<16x128xi32>
    %2 = vector.broadcast %0 : vector<16x1xi32> to vector<16x128xi32>
    %3 = arith.cmpi eq, %1, %2 : vector<16x128xi32>
    %4 = arith.extui %3 : vector<16x128xi1> to vector<16x128xi32>
    %5 = arith.sitofp %4 : vector<16x128xi32> to vector<16x128xf32>
    %c0_1 = arith.constant 0 : index
    %c0_2 = arith.constant 0 : index
    %6 = vector.load %arg2[%c0_1, %c0_2] : memref<16x128xf32, #tpu.memory_space<vmem>>, vector<16x128xf32>
    tpu.vector_store %arg2[%c0_1, %c0_2], %5 {strides = array<i32>} : memref<16x128xf32, #tpu.memory_space<vmem>>, vector<16x128xf32>,
    return
  }
  func.func @transform_0(%arg0: i32) -> (i32, i32) {
    %c0_i32 = arith.constant 0 : i32
    %c0_i32_0 = arith.constant 0 : i32
    return %arg0, %c0_i32 : i32, i32
  }
  func.func @transform_1(%arg0: i32) -> (i32, i32) {
    %c0_i32 = arith.constant 0 : i32
    %c0_i32_0 = arith.constant 0 : i32
    return %arg0, %c0_i32 : i32, i32
  }
}

</mosaic_0001>

<bundles_post_ra>
// kernel: tpu_custom_call.1
= control target key start
LH: loop header
LB: loop body
LE: loop exit
PB: predicated region body
PF: predicated region fallthrough
CT: control target
= control target key end

     0   :  { %s103_s0 = inlined_call_operand.vmem [shape: s32[16,1], index: 0, kind: input, shape index: {}]   ;;  %s104_s1 = inlined_call_operand.hbm [shape: f32[16,128], index: 1, kind: output, shape index: {}]  }
   0x1   :  { %v9_v0 = vld [vmem:[%s103_s0] sm:$0xff] }
   0x2   :  { %6 = vsyncpa [#allocation3], 0  ;;  %v79_v1 = vmov 0   ;;  %v10_v2 = vld [vmem:[%s103_s0 + $0x8] sm:$0xff]  ;;  %v11_v3 = vlaneseq  ;;  %v80_v6 = vmov 0.0   ;;  %s81_s10 = smov [#allocation2]  }
   0x3   :  { %52 = vset.pattern.permute.xlu0 %v79_v1  ;;  %s31_s11 = sshll.u32 %s81_s10, 4  ;;  %s33_s14 = sshll.u32 %s104_s1, 4  ;;  %s32_s11 = int_to_ptr.vmem [resolvable:$true] %s31_s11  ;;  %s34_s14 = int_to_ptr.hbm [resolvable:$true] %s33_s14 }
   0x4   :  { %14 = vperm.xlu0 %52, %v9_v0   ;;  %v12_v4 = vand.u32 127, %v11_v3  ;;  %s82_s0 = smov 128   ;;  %s83_s15 = smov 8  }
   0xc   :  { %17 = vperm.xlu0 %52, %v10_v2  }
  0x76   :  { %v15_v5 = vpop.permute.xlu0 %14 }
  0x77   :  { %vm19_vm0 = vcmp.eq.s32.totalorder %v12_v4, %v15_v5 }
  0x78   :  { %v45_v7 = vsel %vm19_vm0, 1.0, %v80_v6 }
  0x79   :  { %25 = vst [vmem:[#allocation2] sm:$0xff] %v45_v7 }
  0x7e   :  { %v18_v8 = vpop.permute.xlu0 %17 }
  0x7f   :  { %vm20_vm1 = vcmp.eq.s32.totalorder %v12_v4, %v18_v8 }
  0x80   :  { %v46_v9 = vsel %vm20_vm1, 1.0, %v80_v6 }
  0x81   :  { %26 = vst [vmem:[#allocation2 + $0x8] sm:$0xff] %v46_v9 }
  0x82   :  { %39 = dma.vmem_to_hbm [thread:$0]  %s32_s11, 256, %s34_s14, [#allocation3], %s82_s0, %s82_s0, %s83_s15  }
  0x83   :  { %77 = dma.done.wait [#allocation3], 256  }
  0x84   :  { %78 = vsyncadd [#allocation3], 4294967040 }
  0x85   :  { %44 = vsyncpa [#allocation3], 1 }

</bundles_post_ra>
